<compile_context>
chip_gen: v7x
topology: tpu7x:2x2x1
jax: 0.10.0
libtpu: 0.0.40
codegen_flags: <defaults>
</compile_context>

<pallas_src>
import jax
import jax.numpy as jnp
from jax.experimental import pallas as pl
from jax.experimental.pallas import tpu as pltpu


# ---------------------------------------------------------------------------
# Kernel
# ---------------------------------------------------------------------------
def decoder_kernel(x_ref, w1_ref, b1_ref, w2_ref, b2_ref, o_ref):
    # Two MXU matmuls + EUP sigmoids, fully fused in VMEM, f32 accumulation.
    x = x_ref[...]
    h = jnp.dot(x, w1_ref[...], preferred_element_type=jnp.float32) + b1_ref[...]
    h = jax.nn.sigmoid(h)
    y = jnp.dot(h, w2_ref[...], preferred_element_type=jnp.float32) + b2_ref[...]
    o_ref[...] = jax.nn.sigmoid(y).astype(o_ref.dtype)


# ---------------------------------------------------------------------------
# Helpers
# ---------------------------------------------------------------------------
def _round_up(n, m):
    return ((n + m - 1) // m) * m


_SINGLE_BLOCK_MAX = 8192   # single-TC gens: one block up to here (~12 MiB f32)
_MAX_BLOCK_B = 4096        # cap per-step rows on the gridded path


def _has_two_tensorcores():
    """Heuristic megacore detection (v7x). Failure just means 1-TC defaults."""
    try:
        kind = jax.devices()[0].device_kind.lower()
    except Exception:
        return False
    return ("v7" in kind) or ("tpu7" in kind)


def _choose_block_b(B, two_tc):
    if two_tc and B >= 512:
        # v7x: even number of balanced steps so the two TensorCores get equal
        # halves of the "parallel" batch axis.
        n_steps = 2 * pl.cdiv(B, 2 * _MAX_BLOCK_B)      # >= 2, always even
        return _round_up(pl.cdiv(B, n_steps), 8)
    # Single TC (v5e/v6e) or tiny batch: grid steps are pure serial overhead,
    # so prefer one block; fall back to large blocks for very big B.
    if B <= _SINGLE_BLOCK_MAX:
        return B
    n_steps = pl.cdiv(B, _MAX_BLOCK_B)
    return _round_up(pl.cdiv(B, n_steps), 8)


# ---------------------------------------------------------------------------
# Parameter init / one-time prep (all padding lives here, not per call)
# ---------------------------------------------------------------------------
def init_decoder_params(key, D_in, H, D_out, dtype=jnp.float32):
    """Deterministic init mimicking torch.nn.Linear (uniform +/- 1/sqrt(fan_in)).
    Weights stored already transposed: (in_features, out_features)."""
    k1, k2, k3, k4 = jax.random.split(key, 4)
    bound1 = 1.0 / jnp.sqrt(D_in)
    bound2 = 1.0 / jnp.sqrt(H)
    w1 = jax.random.uniform(k1, (D_in, H), dtype, -bound1, bound1)
    b1 = jax.random.uniform(k2, (1, H), dtype, -bound1, bound1)
    w2 = jax.random.uniform(k3, (H, D_out), dtype, -bound2, bound2)
    b2 = jax.random.uniform(k4, (1, D_out), dtype, -bound2, bound2)
    return w1, b1, w2, b2


def prepare_decoder_params(w1, b1, w2, b2):
    """One-time weight prep: pad hidden dim H to a multiple of 128.

    Padded hidden columns produce sigmoid(0) = 0.5, but the matching (zero)
    rows added to w2 cancel them, so the forward result is unchanged while the
    intermediate `h` becomes lane-dense and the second matmul gets a
    128-aligned contraction dim. D_out is left unpadded (kernel does a masked
    store, avoiding a per-call pad + output slice).
    """
    D_in, H = w1.shape
    D_out = w2.shape[1]
    H_pad = _round_up(max(H, 128), 128)
    if H_pad != H:
        w1 = jnp.pad(w1, ((0, 0), (0, H_pad - H)))
        b1 = jnp.pad(b1, ((0, 0), (0, H_pad - H)))
        w2 = jnp.pad(w2, ((0, H_pad - H), (0, 0)))
    return w1, b1, w2, b2


# ---------------------------------------------------------------------------
# Forward
# ---------------------------------------------------------------------------
def decoder_forward(x, w1, b1, w2, b2, *, block_b=None):
    """x: (B, D_in); w1: (D_in, Hp); b1: (1, Hp); w2: (Hp, D_out); b2: (1, D_out).

    Weights should come from `prepare_decoder_params` (H already lane-padded);
    unpadded f32 weights also work, just with masked-lane layouts internally.
    """
    B, D_in = x.shape
    H_pad = w1.shape[1]
    D_out = w2.shape[1]

    if block_b is None:
        block_b = _choose_block_b(B, _has_two_tensorcores())
    block_b = min(B, max(8, _round_up(block_b, 8)))  # (8,128) sublane rule

    itemsize = jnp.dtype(x.dtype).itemsize
    cost = pl.CostEstimate(
        flops=2 * B * (D_in * H_pad + H_pad * D_out),
        # sigmoid ~ exp + reciprocal => ~2 EUP ops per element (advisory).
        transcendentals=2 * B * (H_pad + D_out),
        bytes_accessed=(x.size + w1.size + b1.size + w2.size + b2.size
                        + B * D_out) * itemsize,
    )
    cparams = pltpu.CompilerParams(
        dimension_semantics=("parallel",),
        # Per-step working set is << 32 MiB even at block_b=8192 (f32,
        # lane-padded); 32 MiB scoped is safe on all gens (v7x physical 64).
        vmem_limit_bytes=32 * 1024 * 1024,
    )

    if block_b >= B:
        # Single block: no grid at all — zero pipeline bookkeeping; weights,
        # activations and output all live in VMEM as one block.
        vmem = pltpu.MemorySpace.VMEM
        return pl.pallas_call(
            decoder_kernel,
            out_shape=jax.ShapeDtypeStruct((B, D_out), x.dtype),
            in_specs=[pl.BlockSpec(memory_space=vmem)] * 5,
            out_specs=pl.BlockSpec(memory_space=vmem),
            cost_estimate=cost,
        )(x, w1, b1, w2, b2)

    # Batch-tiled path: only B is tiled; weights/biases stay VMEM-resident via
    # constant index_maps. Batch axis is "parallel" (v7x megacore shards it).
    # If B % block_b != 0, the last block is Pallas-padded; the kernel computes
    # sigmoid on those padded rows and the masked writeback discards them.
    n_b = pl.cdiv(B, block_b)
    return pl.pallas_call(
        decoder_kernel,
        out_shape=jax.ShapeDtypeStruct((B, D_out), x.dtype),
        grid=(n_b,),
        in_specs=[
            pl.BlockSpec((block_b, D_in), lambda i: (i, 0)),
            pl.BlockSpec((D_in, H_pad), lambda i: (0, 0)),
            pl.BlockSpec((1, H_pad), lambda i: (0, 0)),
            pl.BlockSpec((H_pad, D_out), lambda i: (0, 0)),
            pl.BlockSpec((1, D_out), lambda i: (0, 0)),
        ],
        out_specs=pl.BlockSpec((block_b, D_out), lambda i: (i, 0)),
        compiler_params=cparams,
        cost_estimate=cost,
    )(x, w1, b1, w2, b2)


def decoder_reference(x, w1, b1, w2, b2):
    h = jax.nn.sigmoid(x @ w1 + b1)
    return jax.nn.sigmoid(h @ w2 + b2)


# ---------------------------------------------------------------------------
# Self-test
# ---------------------------------------------------------------------------
if __name__ == "__main__":
    # Small shapes consistent with the module: D_in=8 (latent), H=32, D_out=64.
    B, D_in, H, D_out = 4, 8, 32, 64

    key = jax.random.PRNGKey(0)
    kx, kp, kx2, kx3 = jax.random.split(key, 4)
    w1, b1, w2, b2 = init_decoder_params(kp, D_in, H, D_out)
    # One-time weight prep (H padded to 128); reference uses the raw weights.
    w1p, b1p, w2p, b2p = prepare_decoder_params(w1, b1, w2, b2)

    # 1) Small-batch (single-block, no-grid) path.
    x = jax.random.normal(kx, (B, D_in), jnp.float32)
    out = jax.block_until_ready(decoder_forward(x, w1p, b1p, w2p, b2p))
    ref = decoder_reference(x, w1, b1, w2, b2)
    assert out.shape == (B, D_out)
    assert jnp.allclose(out, ref, atol=1e-5, rtol=1e-5), "mismatch (single block)"

    # 2) Batch-tiled path with an even, balanced grid (v7x-style 2 steps).
    B_big = 1536
    x_big = jax.random.normal(kx2, (B_big, D_in), jnp.float32)
    out_big = jax.block_until_ready(
        decoder_forward(x_big, w1p, b1p, w2p, b2p, block_b=768))
    ref_big = decoder_reference(x_big, w1, b1, w2, b2)
    assert out_big.shape == (B_big, D_out)
    assert jnp.allclose(out_big, ref_big, atol=1e-5, rtol=1e-5), "mismatch (tiled)"

    # 3) Ragged last block (B not a multiple of block_b): padded rows are
    #    computed then masked out on writeback.
    B_rag = 100
    x_rag = jax.random.normal(kx3, (B_rag, D_in), jnp.float32)
    out_rag = jax.block_until_ready(
        decoder_forward(x_rag, w1p, b1p, w2p, b2p, block_b=64))
    ref_rag = decoder_reference(x_rag, w1, b1, w2, b2)
    assert out_rag.shape == (B_rag, D_out)
    assert jnp.allclose(out_rag, ref_rag, atol=1e-5, rtol=1e-5), "mismatch (ragged)"

    print("KERNEL_OK")
</pallas_src>

<mosaic_0001>
module attributes {stable_mosaic.version = 11 : i64} {
  func.func @decoder_kernel(%arg0: memref<4x8xf32, #tpu.memory_space<vmem>>, %arg1: memref<8x128xf32, #tpu.memory_space<vmem>>, %arg2: memref<1x128xf32, #tpu.memory_space<vmem>>, %arg3: memref<128x64xf32, #tpu.memory_space<vmem>>, %arg4: memref<1x64xf32, #tpu.memory_space<vmem>>, %arg5: memref<4x64xf32, #tpu.memory_space<vmem>>) attributes {dimension_semantics = [], scalar_prefetch = 0 : i64, scratch_operands = 0 : i64, tpu.core_type = #tpu.core_type<tc>} {
    %c0 = arith.constant 0 : index
    %c0_0 = arith.constant 0 : index
    %0 = vector.load %arg0[%c0, %c0_0] : memref<4x8xf32, #tpu.memory_space<vmem>>, vector<4x8xf32>
    %c0_1 = arith.constant 0 : index
    %c0_2 = arith.constant 0 : index
    %1 = vector.load %arg1[%c0_1, %c0_2] : memref<8x128xf32, #tpu.memory_space<vmem>>, vector<8x128xf32>
    %cst = arith.constant dense<0.000000e+00> : vector<4x128xf32>
    %2 = tpu.matmul %0, %1, %cst {dimension_numbers = #tpu.dot_dimension_numbers<[1], [0], [0], [1], [0, 0, 1, 1], [], []>} : vector<4x8xf32>, vector<8x128xf32>, vector<4x128xf32> -> vector<4x128xf32>
    %c0_3 = arith.constant 0 : index
    %c0_4 = arith.constant 0 : index
    %3 = vector.load %arg2[%c0_3, %c0_4] : memref<1x128xf32, #tpu.memory_space<vmem>>, vector<1x128xf32>
    %4 = vector.broadcast %3 : vector<1x128xf32> to vector<4x128xf32>
    %5 = arith.addf %2, %4 : vector<4x128xf32>
    %6 = arith.negf %5 : vector<4x128xf32>
    %7 = math.exp %6 : vector<4x128xf32>
    %cst_5 = arith.constant 1.000000e+00 : f32
    %8 = vector.broadcast %cst_5 : f32 to vector<4x128xf32>
    %9 = arith.addf %8, %7 : vector<4x128xf32>
    %10 = arith.divf %8, %9 : vector<4x128xf32>
    %c0_6 = arith.constant 0 : index
    %c0_7 = arith.constant 0 : index
    %11 = vector.load %arg3[%c0_6, %c0_7] : memref<128x64xf32, #tpu.memory_space<vmem>>, vector<128x64xf32>
    %cst_8 = arith.constant dense<0.000000e+00> : vector<4x64xf32>
    %12 = tpu.matmul %10, %11, %cst_8 {dimension_numbers = #tpu.dot_dimension_numbers<[1], [0], [0], [1], [0, 0, 1, 1], [], []>} : vector<4x128xf32>, vector<128x64xf32>, vector<4x64xf32> -> vector<4x64xf32>
    %c0_9 = arith.constant 0 : index
    %c0_10 = arith.constant 0 : index
    %13 = vector.load %arg4[%c0_9, %c0_10] : memref<1x64xf32, #tpu.memory_space<vmem>>, vector<1x64xf32>
    %14 = vector.broadcast %13 : vector<1x64xf32> to vector<4x64xf32>
    %15 = arith.addf %12, %14 : vector<4x64xf32>
    %16 = arith.negf %15 : vector<4x64xf32>
    %17 = math.exp %16 : vector<4x64xf32>
    %cst_11 = arith.constant 1.000000e+00 : f32
    %18 = vector.broadcast %cst_11 : f32 to vector<4x64xf32>
    %19 = arith.addf %18, %17 : vector<4x64xf32>
    %20 = arith.divf %18, %19 : vector<4x64xf32>
    %c0_12 = arith.constant 0 : index
    %c0_13 = arith.constant 0 : index
    %21 = vector.load %arg5[%c0_12, %c0_13] : memref<4x64xf32, #tpu.memory_space<vmem>>, vector<4x64xf32>
    tpu.vector_store %arg5[%c0_12, %c0_13], %20 {strides = array<i32>} : memref<4x64xf32, #tpu.memory_space<vmem>>, vector<4x64xf32>,
    return
  }
}

</mosaic_0001>

<bundles_post_ra>
// kernel: tpu_custom_call.1
= control target key start
LH: loop header
LB: loop body
LE: loop exit
PB: predicated region body
PF: predicated region fallthrough
CT: control target
= control target key end

     0   :  { %vm30_vm0 = vcmask 64512   ;;  %v349_v2 = vmov 0.0   ;;  %vm350_vm1 = vmmov 0   ;;  %v351_v5 = vmov 0.0|0.0   ;;  %s455_s0 = inlined_call_operand.vmem [shape: f32[4,8], index: 0, kind: input, shape index: {}]   ;;  %s456_s1 = inlined_call_operand.vmem [shape: f32[8,128], index: 1, kind: input, shape index: {}]   ;;  %s457_s2 = inlined_call_operand.vmem [shape: f32[1,128], index: 2, kind: input, shape index: {}]   ;;  %s458_s3 = inlined_call_operand.vmem [shape: f32[128,64], index: 3, kind: input, shape index: {}]   ;;  %s459_s4 = inlined_call_operand.vmem [shape: f32[1,64], index: 4, kind: input, shape index: {}]   ;;  %s460_s5 = inlined_call_operand.hbm [shape: f32[4,64], index: 5, kind: output, shape index: {}]  }
   0x1   :  { %v22_v0 = vld [vmem:[%s456_s1] sm:$0xff]  ;;  %249 = vmatprep.subr.mxu0 %v349_v2  ;;  %251 = vmatprep.mubr.msk.f32.mxu0 %vm350_vm1, %v349_v2  ;;  %v111_v4 = vld [vmem:[%s458_s3 + $0x8] sm:$0xff] }
   0x2   :  { %v21_v1 = vld [vmem:[%s455_s0] sm:$0xf]  ;;  %250 = vmatpush3.msra.mxu0 %v22_v0  ;;  %289 = vmatprep.subr.bf16.mxu1 %v351_v5 }
   0x3   :  { %v110_v3 = vld [vmem:[%s458_s3] sm:$0xff] }
   0x4   :  { %v290_v6 = vpack.c.bf16 %v111_v4, %v110_v3 }
   0x5   :  { %10 = vsyncpa [#allocation3], 0  ;;  %252 = vmatmul.mubr.msk.f32.vlgmr.msra.gmra.mrb[0].mxu0 %vm30_vm0, %v21_v1  ;;  %286 = vmatprep.mubr.msk.f32.mxu1 %vm350_vm1, %v349_v2  ;;  %v112_v7 = vld [vmem:[%s458_s3 + $0x10] sm:$0xff]  ;;  %v113_v8 = vld [vmem:[%s458_s3 + $0x18] sm:$0xff]  ;;  %vm209_vm2 = vcmask 519168  }
   0x6   :  { %291 = vmatpush3.bf16.msra.mxu1 %v290_v6  ;;  %v293_v9 = vpack.c.bf16 %v113_v8, %v112_v7  ;;  %v114_v10 = vld [vmem:[%s458_s3 + $0x20] sm:$0xff]  ;;  %v115_v11 = vld [vmem:[%s458_s3 + $0x28] sm:$0xff]  ;;  %v116_v13 = vld [vmem:[%s458_s3 + $0x30] sm:$0xff] }
   0x7   :  { %292 = vmatprep.subr.bf16.mxu1 %v351_v5  ;;  %v296_v12 = vpack.c.bf16 %v115_v11, %v114_v10  ;;  %v117_v14 = vld [vmem:[%s458_s3 + $0x38] sm:$0xff]  ;;  %v118_v16 = vld [vmem:[%s458_s3 + $0x40] sm:$0xff]  ;;  %v119_v17 = vld [vmem:[%s458_s3 + $0x48] sm:$0xff] }
   0x8   :  { %v299_v15 = vpack.c.bf16 %v117_v14, %v116_v13  ;;  %v302_v18 = vpack.c.bf16 %v119_v17, %v118_v16  ;;  %v120_v19 = vld [vmem:[%s458_s3 + $0x50] sm:$0xff]  ;;  %v121_v20 = vld [vmem:[%s458_s3 + $0x58] sm:$0xff]  ;;  %v122_v22 = vld [vmem:[%s458_s3 + $0x60] sm:$0xff] }
   0x9   :  { %v305_v21 = vpack.c.bf16 %v121_v20, %v120_v19  ;;  %v123_v23 = vld [vmem:[%s458_s3 + $0x68] sm:$0xff]  ;;  %v124_v25 = vld [vmem:[%s458_s3 + $0x70] sm:$0xff]  ;;  %v125_v26 = vld [vmem:[%s458_s3 + $0x78] sm:$0xff] }
   0xa   :  { %294 = vmatpush3.bf16.msra.mxu1 %v293_v9  ;;  %v308_v24 = vpack.c.bf16 %v123_v23, %v122_v22  ;;  %v311_v27 = vpack.c.bf16 %v125_v26, %v124_v25  ;;  %v225_v28 = vld [vmem:[%s457_s2] ss:$0 sm:$0xff]  ;;  %s352_s2 = smov [#allocation2]  }
   0xb   :  { %295 = vmatprep.subr.bf16.mxu1 %v351_v5  ;;  %v228_v36 = vld [vmem:[%s459_s4] ss:$0 sm:$0xff]  ;;  %s217_s28 = sshll.u32 %s352_s2, 4  ;;  %s218_s28 = int_to_ptr.vmem [resolvable:$true] %s217_s28 }
   0xc   :  { %s325_s29 = scalar_lea.vmem %s218_s28, 64  ;;  %p330_p1 = scmp.lt.s32.totalorder %s218_s28, %s218_s28 }
   0xd   :  { %p326_p0 = scmp.ne.s32.totalorder %s218_s28, %s325_s29  ;;  %p331_p2 = scmp.lt.s32.totalorder %s325_s29, %s325_s29 }
   0xe   :  { %297 = vmatpush3.bf16.msra.mxu1 %v296_v12 }
   0xf   :  { %298 = vmatprep.subr.bf16.mxu1 %v351_v5  ;;  %p332_p3 = por %p331_p2, %p330_p1 }
  0x11   :  { %p333_p4 = pnand %p332_p3, %p326_p0 }
  0x12   :  { %300 = vmatpush3.bf16.msra.mxu1 %v299_v15 }
  0x13   :  { %301 = vmatprep.subr.bf16.mxu1 %v351_v5 }
  0x16   :  { %303 = vmatpush3.bf16.msra.mxu1 %v302_v18 }
  0x17   :  { %304 = vmatprep.subr.bf16.mxu1 %v351_v5 }
  0x1a   :  { %306 = vmatpush3.bf16.msra.mxu1 %v305_v21 }
  0x1b   :  { %307 = vmatprep.subr.bf16.mxu1 %v351_v5 }
  0x1e   :  { %309 = vmatpush3.bf16.msra.mxu1 %v308_v24 }
  0x1f   :  { %310 = vmatprep.subr.bf16.mxu1 %v351_v5 }
  0x22   :  { %312 = vmatpush3.bf16.msra.mxu1 %v311_v27 }
  0xd8   :  { %v100_v29 = vpop.f32.mrb[0].mxu0 }
  0xd9   :  { %v101_v30 = vadd.f32 %v225_v28, %v100_v29  ;;  %v253_v31 = vpop.f32.mrb[1].mxu0 }
  0xdb   :  { %v227_v32 = vmul.f32 -1.442695, %v101_v30 }
  0xdd   :  { %317 = vpow2.f32 %v227_v32 }
  0xe7   :  { %v318_v33 = vpop.eup %317 }
  0xe8   :  { %v107_v34 = vadd.f32 1.0, %v318_v33 }
  0xea   :  { %319 = vrcp.f32 %v107_v34 }
  0xf4   :  { %v320_v35 = vpop.eup %319 }
  0xf5   :  { %287 = vmatmul.mubr.f32.vlgmr.msra.gmra.mrb[0].mxu1 %v320_v35 }
 0x1c8   :  { %v199_v37 = vpop.f32.mrb[0].mxu1 }
 0x1c9   :  { %v200_v38 = vadd.f32 %v228_v36, %v199_v37  ;;  %v288_v39 = vpop.f32.mrb[1].mxu1 }
 0x1cb   :  { %v229_v40 = vmul.f32 -1.442695, %v200_v38 }
 0x1cd   :  { %321 = vpow2.f32 %v229_v40 }
 0x1d7   :  { %v322_v41 = vpop.eup %321 }
 0x1d8   :  { %v206_v42 = vadd.f32 1.0, %v322_v41 }
 0x1da   :  { %323 = vrcp.f32 %v206_v42 }
 0x1e4   :  { %v324_v43 = vpop.eup %323 }
 0x1e5   :  { %210 = vst.msk [vmem:[#allocation2] sm:$0xf] %vm209_vm2, %v324_v43 }
 0x1e6   :  { %336 = shalt.err (!%p333_p4)
}
 0x1e7   :  { %s337_s6 = scalar_lea.hbm %s460_s5, 64 }
 0x1e8   :  { %p338_p5 = scmp.ne.s32.totalorder %s460_s5, %s337_s6  ;;  %p341_p6 = scmp.lt.u32.totalorder %s337_s6, %s460_s5 }
 0x1ea   :  { %p343_p7 = pnand %p341_p6, %p338_p5 }
 0x1ec   :  { %346 = shalt.err (!%p343_p7)
}
 0x1ed   :  { %220 = dma.vmem_to_hbm [thread:$0]  %s218_s28, 64, %s460_s5, [#allocation3]  }
 0x1ee   :  { %347 = dma.done.wait [#allocation3], 64  }
 0x1ef   :  { %348 = vsyncadd [#allocation3], 4294967232 }
 0x1f0   :  { %224 = vsyncpa [#allocation3], 1 }

</bundles_post_ra>
